<compile_context>
chip_gen: v6e
topology: v6e:2x2x1
jax: 0.10.0
libtpu: 0.0.40
codegen_flags: <defaults>
</compile_context>

<pallas_src>
import jax
import jax.numpy as jnp
from jax.experimental import pallas as pl
from jax.experimental.pallas import tpu as pltpu

NEG_SLOPE = 0.2   # LeakyReLU slope
BN_EPS = 1e-5     # BatchNorm1d eps
LANE = 128
SUBLANE = 8


def _leaky(z):
    return jnp.where(z >= 0, z, NEG_SLOPE * z)


def _round_up(v, m):
    return (v + m - 1) // m * m


def _pick_tile(n, cap):
    """Largest multiple-of-128 tile <= cap that divides n (n is a mult. of 128)."""
    t = min(cap, n)
    while n % t:
        t -= LANE
    return t


def _pad2(a, rows, cols):
    r, c = a.shape
    return jnp.pad(a, ((0, rows - r), (0, cols - c)))


def _fold_bn_into_linear(w, b, gamma, beta, rmean, rvar):
    """Eval-mode BatchNorm1d followed by Linear(w, b)  ==  Linear(w', b')."""
    scale = gamma * jax.lax.rsqrt(rvar + BN_EPS)       # (1, d)
    shift = beta - rmean * scale                       # (1, d)
    w_f = w * scale.reshape(-1, 1)                     # diag(scale) @ w
    b_f = shift @ w + b
    return w_f, b_f


# ----------------------------- kernels ------------------------------------ #

def ginconv_kernel(adj_ref, h_ref, w1_ref, w2_ref, bias_ref, out_ref, acc_ref):
    """One GINConv (eps=0) layer: leaky(leaky((adj+I)@h @ w1 + b1) @ w2' + b2')."""
    k = pl.program_id(1)

    @pl.when(k == 0)
    def _():
        acc_ref[...] = jnp.zeros_like(acc_ref)

    # bf16 x bf16 MXU matmul, f32 accumulation.
    acc_ref[...] += jnp.dot(adj_ref[...], h_ref[...],
                            preferred_element_type=jnp.float32)

    @pl.when(k == pl.num_programs(1) - 1)
    def _():
        z = jnp.dot(acc_ref[...], w1_ref[...],
                    preferred_element_type=jnp.float32) + bias_ref[0:1, :]
        z = _leaky(z)
        # BatchNorm already folded into w2 / bias row 1 on the host.
        z = jnp.dot(z, w2_ref[...],
                    preferred_element_type=jnp.float32) + bias_ref[1:2, :]
        z = _leaky(z)
        # dropout is identity in eval mode
        out_ref[...] = z.astype(out_ref.dtype)


def pool_fc_kernel(pool_ref, h_ref, wfc_ref, bfc_ref, out_ref, acc_ref):
    """global_add_pool (pool @ h) reduced over N tiles, then BN-folded fc."""
    k = pl.program_id(0)

    @pl.when(k == 0)
    def _():
        acc_ref[...] = jnp.zeros_like(acc_ref)

    acc_ref[...] += jnp.dot(pool_ref[...], h_ref[...],
                            preferred_element_type=jnp.float32)

    @pl.when(k == pl.num_programs(0) - 1)
    def _():
        out_ref[...] = (jnp.dot(acc_ref[...], wfc_ref[...],
                                preferred_element_type=jnp.float32)
                        + bfc_ref[0:1, :])


# ----------------------------- wrappers ----------------------------------- #

def _ginconv_call(adj, h, w1, w2, bias_slab, *, tm, tk, vmem_limit):
    n_pad = adj.shape[0]
    fin = h.shape[1]
    fout = w1.shape[1]
    grid = (n_pad // tm, n_pad // tk)
    return pl.pallas_call(
        ginconv_kernel,
        out_shape=jax.ShapeDtypeStruct((n_pad, fout), jnp.bfloat16),
        grid=grid,
        in_specs=[
            pl.BlockSpec((tm, tk), lambda i, k: (i, k)),          # adj tile
            pl.BlockSpec((tk, fin), lambda i, k: (k, 0)),         # h tile
            pl.BlockSpec((fin, fout), lambda i, k: (0, 0)),       # w1 (whole)
            pl.BlockSpec((fout, fout), lambda i, k: (0, 0)),      # w2' (whole)
            pl.BlockSpec((SUBLANE, fout), lambda i, k: (0, 0)),   # packed biases
        ],
        out_specs=pl.BlockSpec((tm, fout), lambda i, k: (i, 0)),
        scratch_shapes=[pltpu.VMEM((tm, fin), jnp.float32)],
        compiler_params=pltpu.CompilerParams(
            dimension_semantics=("parallel", "arbitrary"),
            vmem_limit_bytes=vmem_limit),
    )(adj, h, w1, w2, bias_slab)


def _pool_fc_call(pool, h, wfc, bfc_slab, *, tk, vmem_limit):
    g_pad, n_pad = pool.shape
    h_dim = h.shape[1]
    l_dim = wfc.shape[1]
    grid = (n_pad // tk,)
    return pl.pallas_call(
        pool_fc_kernel,
        out_shape=jax.ShapeDtypeStruct((g_pad, l_dim), jnp.float32),
        grid=grid,
        in_specs=[
            pl.BlockSpec((g_pad, tk), lambda k: (0, k)),          # pool tile
            pl.BlockSpec((tk, h_dim), lambda k: (k, 0)),          # h tile
            pl.BlockSpec((h_dim, l_dim), lambda k: (0, 0)),       # wfc' (whole)
            pl.BlockSpec((SUBLANE, l_dim), lambda k: (0, 0)),     # bfc' slab
        ],
        out_specs=pl.BlockSpec((g_pad, l_dim), lambda k: (0, 0)),
        scratch_shapes=[pltpu.VMEM((g_pad, h_dim), jnp.float32)],
        compiler_params=pltpu.CompilerParams(
            dimension_semantics=("arbitrary",),
            vmem_limit_bytes=vmem_limit),
    )(pool, h, wfc, bfc_slab)


def gin_forward(x, edge_index, batch, params, num_graphs):
    """x: [N, input_dim] f32, edge_index: [2, E] int32 (row0=src, row1=dst),
    batch: [N] int32 graph ids, params: flat list (same order as init_params)."""
    (w1a, b1a, ga, bea, rma, rva, w2a, b2a,
     w1b, b1b, gb, beb, rmb, rvb, w2b, b2b,
     gf, bef, rmf, rvf, wfc, bfc) = params

    n_nodes, input_dim = x.shape
    hidden_dim = w1a.shape[1]
    latent_dim = wfc.shape[1]

    n_pad = _round_up(n_nodes, LANE)
    f_pad = _round_up(input_dim, LANE)
    h_pad = _round_up(hidden_dim, LANE)
    l_pad = _round_up(latent_dim, LANE)
    g_pad = _round_up(num_graphs, SUBLANE)

    # Adjacency tiles sized to fit comfortably in v7x's 64 MiB / 32 MiB-scoped VMEM.
    tm = _pick_tile(n_pad, 256)
    tk = _pick_tile(n_pad, 512)
    vmem_limit = 32 * 1024 * 1024

    # --- host-side param prep: fold eval-mode BatchNorm into the next Linear ---
    w2a_f, b2a_f = _fold_bn_into_linear(w2a, b2a, ga, bea, rma, rva)
    w2b_f, b2b_f = _fold_bn_into_linear(w2b, b2b, gb, beb, rmb, rvb)
    wfc_f, bfc_f = _fold_bn_into_linear(wfc, bfc, gf, bef, rmf, rvf)

    # Lane-dense f32 weight slabs (zero-padded -> padded lanes stay exactly 0).
    w1a_p = _pad2(w1a, f_pad, h_pad)
    w2a_p = _pad2(w2a_f, h_pad, h_pad)
    w1b_p = _pad2(w1b, h_pad, h_pad)
    w2b_p = _pad2(w2b_f, h_pad, h_pad)
    wfc_p = _pad2(wfc_f, h_pad, l_pad)

    # Pack per-layer biases into single (8, dim) slabs (rows 0/1 used).
    bias_a = (jnp.zeros((SUBLANE, h_pad), jnp.float32)
              .at[0, :hidden_dim].set(b1a.reshape(-1))
              .at[1, :hidden_dim].set(b2a_f.reshape(-1)))
    bias_b = (jnp.zeros((SUBLANE, h_pad), jnp.float32)
              .at[0, :hidden_dim].set(b1b.reshape(-1))
              .at[1, :hidden_dim].set(b2b_f.reshape(-1)))
    bias_fc = (jnp.zeros((SUBLANE, l_pad), jnp.float32)
               .at[0, :latent_dim].set(bfc_f.reshape(-1)))

    # Dense adjacency with self-loops: (adj + I) @ h == eps=0 GIN aggregation.
    # bf16 is exact for small integer edge multiplicities.
    adj = jnp.zeros((n_pad, n_pad), jnp.float32)
    adj = adj.at[edge_index[1], edge_index[0]].add(1.0)
    adj = (adj + jnp.eye(n_pad, dtype=jnp.float32)).astype(jnp.bfloat16)

    # One-hot global_add_pool matrix; padded nodes belong to no graph.
    batch_p = jnp.full((n_pad,), -1, jnp.int32).at[:n_nodes].set(batch)
    pool = (batch_p[None, :] == jnp.arange(g_pad, dtype=jnp.int32)[:, None]
            ).astype(jnp.bfloat16)

    h0 = _pad2(x.astype(jnp.float32), n_pad, f_pad).astype(jnp.bfloat16)

    h1 = _ginconv_call(adj, h0, w1a_p, w2a_p, bias_a,
                       tm=tm, tk=tk, vmem_limit=vmem_limit)
    h2 = _ginconv_call(adj, h1, w1b_p, w2b_p, bias_b,
                       tm=tm, tk=tk, vmem_limit=vmem_limit)
    out = _pool_fc_call(pool, h2, wfc_p, bias_fc, tk=tk, vmem_limit=vmem_limit)
    return out[:num_graphs, :latent_dim]


def init_params(key, input_dim, hidden_dim, latent_dim):
    """Deterministic parameter init for a 2-conv-layer GIN (n_layers = 2)."""
    keys = jax.random.split(key, 8)

    def linear(k, fan_in, fan_out):
        kw, kb = jax.random.split(k)
        w = jax.random.normal(kw, (fan_in, fan_out), jnp.float32) * 0.1
        b = jax.random.normal(kb, (1, fan_out), jnp.float32) * 0.01
        return w, b

    def bn_params(dim):
        # PyTorch BatchNorm1d default: gamma=1, beta=0, running stats (0, 1).
        return (jnp.ones((1, dim), jnp.float32), jnp.zeros((1, dim), jnp.float32),
                jnp.zeros((1, dim), jnp.float32), jnp.ones((1, dim), jnp.float32))

    # conv layer 0
    w1a, b1a = linear(keys[0], input_dim, hidden_dim)
    ga, bea, rma, rva = bn_params(hidden_dim)
    w2a, b2a = linear(keys[1], hidden_dim, hidden_dim)
    # conv layer 1
    w1b, b1b = linear(keys[2], hidden_dim, hidden_dim)
    gb, beb, rmb, rvb = bn_params(hidden_dim)
    w2b, b2b = linear(keys[3], hidden_dim, hidden_dim)
    # final bn + fc
    gf, bef, rmf, rvf = bn_params(hidden_dim)
    wfc, bfc = linear(keys[4], hidden_dim, latent_dim)

    return [w1a, b1a, ga, bea, rma, rva, w2a, b2a,
            w1b, b1b, gb, beb, rmb, rvb, w2b, b2b,
            gf, bef, rmf, rvf, wfc, bfc]


if __name__ == "__main__":
    key = jax.random.PRNGKey(0)
    num_graphs = 2
    nodes_per_graph = 8
    n_nodes = num_graphs * nodes_per_graph     # 16 nodes total
    input_dim, hidden_dim, latent_dim = 8, 32, 16

    kx, kp = jax.random.split(key)
    x = jax.random.normal(kx, (n_nodes, input_dim), jnp.float32)

    # Bidirectional ring edges inside each graph.
    src, dst = [], []
    for g in range(num_graphs):
        base = g * nodes_per_graph
        for i in range(nodes_per_graph):
            j = (i + 1) % nodes_per_graph
            src += [base + i, base + j]
            dst += [base + j, base + i]
    edge_index = jnp.array([src, dst], dtype=jnp.int32)
    batch = jnp.repeat(jnp.arange(num_graphs, dtype=jnp.int32), nodes_per_graph)

    params = init_params(kp, input_dim, hidden_dim, latent_dim)

    out = gin_forward(x, edge_index, batch, params, num_graphs)
    out = jax.block_until_ready(out)
    assert out.shape == (num_graphs, latent_dim) and out.dtype == jnp.float32
    assert bool(jnp.all(jnp.isfinite(out)))
    print("KERNEL_OK")
</pallas_src>

<mosaic_0001>
module attributes {stable_mosaic.version = 11 : i64} {
  func.func @ginconv_kernel(%arg0: i32, %arg1: i32, %arg2: memref<128x128xbf16, #tpu.memory_space<vmem>>, %arg3: memref<128x128xbf16, #tpu.memory_space<vmem>>, %arg4: memref<128x128xf32, #tpu.memory_space<vmem>>, %arg5: memref<128x128xf32, #tpu.memory_space<vmem>>, %arg6: memref<8x128xf32, #tpu.memory_space<vmem>>, %arg7: memref<128x128xbf16, #tpu.memory_space<vmem>>, %arg8: memref<128x128xf32, #tpu.memory_space<vmem>>) attributes {dimension_semantics = [#tpu.dimension_semantics<parallel>, #tpu.dimension_semantics<arbitrary>], iteration_bounds = array<i64: 1, 1>, scalar_prefetch = 0 : i64, scratch_operands = 1 : i64, tpu.core_type = #tpu.core_type<tc>, window_params = [{transform_indices = @transform_0, window_bounds = array<i64: 128, 128>}, {transform_indices = @transform_1, window_bounds = array<i64: 128, 128>}, {pipeline_mode = #tpu.pipeline_mode<synchronous>, transform_indices = @transform_2, window_bounds = array<i64: 128, 128>}, {pipeline_mode = #tpu.pipeline_mode<synchronous>, transform_indices = @transform_3, window_bounds = array<i64: 128, 128>}, {pipeline_mode = #tpu.pipeline_mode<synchronous>, transform_indices = @transform_4, window_bounds = array<i64: 8, 128>}, {transform_indices = @transform_5, window_bounds = array<i64: 128, 128>}]} {
    %c0_i32 = arith.constant 0 : i32
    %0 = arith.cmpi eq, %arg1, %c0_i32 : i32
    %1 = arith.extui %0 : i1 to i32
    %c0_i32_0 = arith.constant 0 : i32
    %2 = arith.cmpi ne, %1, %c0_i32_0 : i32
    scf.if %2 {
      %cst_10 = arith.constant 0.000000e+00 : f32
      %12 = vector.broadcast %cst_10 : f32 to vector<128x128xf32>
      %c0_11 = arith.constant 0 : index
      %c0_12 = arith.constant 0 : index
      %13 = vector.load %arg8[%c0_11, %c0_12] : memref<128x128xf32, #tpu.memory_space<vmem>>, vector<128x128xf32>
      tpu.vector_store %arg8[%c0_11, %c0_12], %12 {strides = array<i32>} : memref<128x128xf32, #tpu.memory_space<vmem>>, vector<128x128xf32>,
    } else {
    }
    %c0 = arith.constant 0 : index
    %c0_1 = arith.constant 0 : index
    %3 = vector.load %arg8[%c0, %c0_1] : memref<128x128xf32, #tpu.memory_space<vmem>>, vector<128x128xf32>
    %c0_2 = arith.constant 0 : index
    %c0_3 = arith.constant 0 : index
    %4 = vector.load %arg2[%c0_2, %c0_3] : memref<128x128xbf16, #tpu.memory_space<vmem>>, vector<128x128xbf16>
    %c0_4 = arith.constant 0 : index
    %c0_5 = arith.constant 0 : index
    %5 = vector.load %arg3[%c0_4, %c0_5] : memref<128x128xbf16, #tpu.memory_space<vmem>>, vector<128x128xbf16>
    %cst = arith.constant dense<0.000000e+00> : vector<128x128xf32>
    %6 = tpu.matmul %4, %5, %cst {dimension_numbers = #tpu.dot_dimension_numbers<[1], [0], [0], [1], [0, 0, 1, 1], [], []>} : vector<128x128xbf16>, vector<128x128xbf16>, vector<128x128xf32> -> vector<128x128xf32>
    %7 = arith.addf %3, %6 : vector<128x128xf32>
    %c0_6 = arith.constant 0 : index
    %c0_7 = arith.constant 0 : index
    %8 = vector.load %arg8[%c0_6, %c0_7] : memref<128x128xf32, #tpu.memory_space<vmem>>, vector<128x128xf32>
    tpu.vector_store %arg8[%c0_6, %c0_7], %7 {strides = array<i32>} : memref<128x128xf32, #tpu.memory_space<vmem>>, vector<128x128xf32>,
    %c0_i32_8 = arith.constant 0 : i32
    %9 = arith.cmpi eq, %arg1, %c0_i32_8 : i32
    %10 = arith.extui %9 : i1 to i32
    %c0_i32_9 = arith.constant 0 : i32
    %11 = arith.cmpi ne, %10, %c0_i32_9 : i32
    scf.if %11 {
      %c0_10 = arith.constant 0 : index
      %c0_11 = arith.constant 0 : index
      %12 = vector.load %arg8[%c0_10, %c0_11] : memref<128x128xf32, #tpu.memory_space<vmem>>, vector<128x128xf32>
      %c0_12 = arith.constant 0 : index
      %c0_13 = arith.constant 0 : index
      %13 = vector.load %arg4[%c0_12, %c0_13] : memref<128x128xf32, #tpu.memory_space<vmem>>, vector<128x128xf32>
      %cst_14 = arith.constant dense<0.000000e+00> : vector<128x128xf32>
      %14 = tpu.matmul %12, %13, %cst_14 {dimension_numbers = #tpu.dot_dimension_numbers<[1], [0], [0], [1], [0, 0, 1, 1], [], []>} : vector<128x128xf32>, vector<128x128xf32>, vector<128x128xf32> -> vector<128x128xf32>
      %c0_15 = arith.constant 0 : index
      %c0_16 = arith.constant 0 : index
      %15 = vector.load %arg6[%c0_15, %c0_16] : memref<8x128xf32, #tpu.memory_space<vmem>>, vector<1x128xf32>
      %16 = vector.broadcast %15 : vector<1x128xf32> to vector<128x128xf32>
      %17 = arith.addf %14, %16 : vector<128x128xf32>
      %cst_17 = arith.constant 0.000000e+00 : f32
      %18 = vector.broadcast %cst_17 : f32 to vector<128x128xf32>
      %19 = arith.cmpf oge, %17, %18 : vector<128x128xf32>
      %cst_18 = arith.constant 2.000000e-01 : f32
      %20 = vector.broadcast %cst_18 : f32 to vector<128x128xf32>
      %21 = arith.mulf %20, %17 : vector<128x128xf32>
      %22 = arith.select %19, %17, %21 : vector<128x128xi1>, vector<128x128xf32>
      %c0_19 = arith.constant 0 : index
      %c0_20 = arith.constant 0 : index
      %23 = vector.load %arg5[%c0_19, %c0_20] : memref<128x128xf32, #tpu.memory_space<vmem>>, vector<128x128xf32>
      %cst_21 = arith.constant dense<0.000000e+00> : vector<128x128xf32>
      %24 = tpu.matmul %22, %23, %cst_21 {dimension_numbers = #tpu.dot_dimension_numbers<[1], [0], [0], [1], [0, 0, 1, 1], [], []>} : vector<128x128xf32>, vector<128x128xf32>, vector<128x128xf32> -> vector<128x128xf32>
      %c1 = arith.constant 1 : index
      %c0_22 = arith.constant 0 : index
      %25 = vector.load %arg6[%c1, %c0_22] : memref<8x128xf32, #tpu.memory_space<vmem>>, vector<1x128xf32>
      %26 = vector.broadcast %25 : vector<1x128xf32> to vector<128x128xf32>
      %27 = arith.addf %24, %26 : vector<128x128xf32>
      %cst_23 = arith.constant 0.000000e+00 : f32
      %28 = vector.broadcast %cst_23 : f32 to vector<128x128xf32>
      %29 = arith.cmpf oge, %27, %28 : vector<128x128xf32>
      %cst_24 = arith.constant 2.000000e-01 : f32
      %30 = vector.broadcast %cst_24 : f32 to vector<128x128xf32>
      %31 = arith.mulf %30, %27 : vector<128x128xf32>
      %32 = arith.select %29, %27, %31 : vector<128x128xi1>, vector<128x128xf32>
      %33 = arith.truncf %32 : vector<128x128xf32> to vector<128x128xbf16>
      %c0_25 = arith.constant 0 : index
      %c0_26 = arith.constant 0 : index
      %34 = vector.load %arg7[%c0_25, %c0_26] : memref<128x128xbf16, #tpu.memory_space<vmem>>, vector<128x128xbf16>
      tpu.vector_store %arg7[%c0_25, %c0_26], %33 {strides = array<i32>} : memref<128x128xbf16, #tpu.memory_space<vmem>>, vector<128x128xbf16>,
    } else {
    }
    return
  }
  func.func @transform_0(%arg0: i32, %arg1: i32) -> (i32, i32) {
    %c0_i32 = arith.constant 0 : i32
    return %arg0, %arg1 : i32, i32
  }
  func.func @transform_1(%arg0: i32, %arg1: i32) -> (i32, i32) {
    %c0_i32 = arith.constant 0 : i32
    %c0_i32_0 = arith.constant 0 : i32
    return %arg1, %c0_i32 : i32, i32
  }
  func.func @transform_2(%arg0: i32, %arg1: i32) -> (i32, i32) {
    %c0_i32 = arith.constant 0 : i32
    %c0_i32_0 = arith.constant 0 : i32
    %c0_i32_1 = arith.constant 0 : i32
    return %c0_i32, %c0_i32_0 : i32, i32
  }
  func.func @transform_3(%arg0: i32, %arg1: i32) -> (i32, i32) {
    %c0_i32 = arith.constant 0 : i32
    %c0_i32_0 = arith.constant 0 : i32
    %c0_i32_1 = arith.constant 0 : i32
    return %c0_i32, %c0_i32_0 : i32, i32
  }
  func.func @transform_4(%arg0: i32, %arg1: i32) -> (i32, i32) {
    %c0_i32 = arith.constant 0 : i32
    %c0_i32_0 = arith.constant 0 : i32
    %c0_i32_1 = arith.constant 0 : i32
    return %c0_i32, %c0_i32_0 : i32, i32
  }
  func.func @transform_5(%arg0: i32, %arg1: i32) -> (i32, i32) {
    %c0_i32 = arith.constant 0 : i32
    %c0_i32_0 = arith.constant 0 : i32
    return %arg0, %c0_i32 : i32, i32
  }
}

</mosaic_0001>

<bundles_post_ra>
// kernel: tpu_custom_call.1
= control target key start
LH: loop header
LB: loop body
LE: loop exit
PB: predicated region body
PF: predicated region fallthrough
CT: control target
= control target key end

     0   :  { %10 = vsyncpa [#allocation4], 0  ;;  %s1537_s0 = inlined_call_operand.hbm [shape: bf16[128,128], index: 0, kind: input, shape index: {}]   ;;  %s1538_s1 = inlined_call_operand.hbm [shape: bf16[128,128], index: 1, kind: input, shape index: {}]   ;;  %s1539_s2 = inlined_call_operand.hbm [shape: f32[128,128], index: 2, kind: input, shape index: {}]   ;;  %s1540_s3 = inlined_call_operand.hbm [shape: f32[128,128], index: 3, kind: input, shape index: {}]   ;;  %s1541_s4 = inlined_call_operand.hbm [shape: f32[8,128], index: 4, kind: input, shape index: {}]   ;;  %s1542_s5 = inlined_call_operand.hbm [shape: bf16[128,128], index: 5, kind: output, shape index: {}]  }
   0x1   :  { %11 = vsyncpa [#allocation7], 0 }
   0x2   :  { %12 = vsyncpa [#allocation10], 0 }
   0x3   :  { %13 = vsyncpa [#allocation5], 0  ;;  %s1434_s18 = smov [#allocation6]  }
   0x4   :  { %s31_s19 = sshll.u32 %s1434_s18, 4  ;;  %s32_s19 = int_to_ptr.vmem [resolvable:$true] %s31_s19 }
   0x5   :  { %s1314_s20 = scalar_lea.vmem %s32_s19, 1024  ;;  %p1319_p1 = scmp.lt.s32.totalorder %s32_s19, %s32_s19 }
   0x6   :  { %p1315_p0 = scmp.ne.s32.totalorder %s32_s19, %s1314_s20  ;;  %p1320_p2 = scmp.lt.s32.totalorder %s1314_s20, %s1314_s20 }
   0x8   :  { %p1321_p3 = por %p1320_p2, %p1319_p1 }
   0xa   :  { %p1322_p4 = pnand %p1321_p3, %p1315_p0 }
   0xc   :  { %1325 = shalt.err (!%p1322_p4)
}
   0xd   :  { %s1435_s21 = smov 64   ;;  %s1436_s22 = smov 4  }
   0xe   :  { %37 = dma.hbm_to_vmem [thread:$0]  %s1538_s1, 1024, %s32_s19, [#allocation7], %s1435_s21, %s1435_s21, %s1436_s22  }
   0xf   :  { %s1437_s25 = smov [#allocation9]   ;;  %s1438_s27 = smov [#allocation3]  }
  0x10   :  { %s55_s26 = sshll.u32 %s1437_s25, 4  ;;  %s19_s28 = sshll.u32 %s1438_s27, 4  ;;  %s56_s26 = int_to_ptr.vmem [resolvable:$true] %s55_s26  ;;  %s20_s28 = int_to_ptr.vmem [resolvable:$true] %s19_s28 }
  0x11   :  { %s1334_s29 = scalar_lea.vmem %s56_s26, 2048  ;;  %p1339_p6 = scmp.lt.s32.totalorder %s56_s26, %s56_s26 }
  0x12   :  { %p1335_p5 = scmp.ne.s32.totalorder %s56_s26, %s1334_s29  ;;  %p1340_p7 = scmp.lt.s32.totalorder %s1334_s29, %s1334_s29 }
  0x14   :  { %p1341_p8 = por %p1340_p7, %p1339_p6 }
  0x16   :  { %p1342_p9 = pnand %p1341_p8, %p1335_p5 }
  0x18   :  { %1345 = shalt.err (!%p1342_p9)
}
  0x19   :  { %s1439_s30 = smov 128   ;;  %s1440_s6 = smov 8  }
  0x1a   :  { %61 = dma.hbm_to_vmem [thread:$0]  %s1540_s3, 2048, %s56_s26, [#allocation10], %s1439_s30, %s1439_s30, %s1440_s6  }
  0x1b   :  { %s1354_s1 = scalar_lea.vmem %s20_s28, 1024  ;;  %p1359_p11 = scmp.lt.s32.totalorder %s20_s28, %s20_s28 }
  0x1c   :  { %p1355_p10 = scmp.ne.s32.totalorder %s20_s28, %s1354_s1  ;;  %p1360_p12 = scmp.lt.s32.totalorder %s1354_s1, %s1354_s1 }
  0x1e   :  { %p1361_p13 = por %p1360_p12, %p1359_p11 }
  0x20   :  { %p1362_p0 = pnand %p1361_p13, %p1355_p10 }
  0x22   :  { %1365 = shalt.err (!%p1362_p0)
}
  0x23   :  { %25 = dma.hbm_to_vmem [thread:$0]  %s1537_s0, 1024, %s20_s28, [#allocation4], %s1435_s21, %s1435_s21, %s1436_s22  }
  0x24   :  { %s1441_s11 = smov [#allocation8]   ;;  %s1442_s13 = smov [#allocation11]  }
  0x25   :  { %s43_s12 = sshll.u32 %s1441_s11, 4  ;;  %s68_s3 = sshll.u32 %s1442_s13, 4  ;;  %s44_s12 = int_to_ptr.vmem [resolvable:$true] %s43_s12  ;;  %s69_s3 = int_to_ptr.vmem [resolvable:$true] %s68_s3 }
  0x26   :  { %s1374_s14 = scalar_lea.vmem %s44_s12, 2048  ;;  %p1379_p2 = scmp.lt.s32.totalorder %s44_s12, %s44_s12 }
  0x27   :  { %p1375_p1 = scmp.ne.s32.totalorder %s44_s12, %s1374_s14  ;;  %p1380_p3 = scmp.lt.s32.totalorder %s1374_s14, %s1374_s14 }
  0x29   :  { %p1381_p4 = por %p1380_p3, %p1379_p2 }
  0x2b   :  { %p1382_p5 = pnand %p1381_p4, %p1375_p1 }
  0x2d   :  { %1385 = shalt.err (!%p1382_p5)
}
  0x2e   :  { %49 = dma.hbm_to_vmem [thread:$0]  %s1539_s2, 2048, %s44_s12, [#allocation7], %s1439_s30, %s1439_s30, %s1440_s6  }
  0x2f   :  { %s1394_s17 = scalar_lea.vmem %s69_s3, 128  ;;  %p1399_p7 = scmp.lt.s32.totalorder %s69_s3, %s69_s3 }
  0x30   :  { %p1395_p6 = scmp.ne.s32.totalorder %s69_s3, %s1394_s17  ;;  %p1400_p8 = scmp.lt.s32.totalorder %s1394_s17, %s1394_s17 }
  0x32   :  { %p1401_p9 = por %p1400_p8, %p1399_p7 }
  0x34   :  { %p1402_p10 = pnand %p1401_p9, %p1395_p6 }
  0x36   :  { %1405 = shalt.err (!%p1402_p10)
}
  0x37   :  { %71 = dma.hbm_to_vmem [thread:$0]  %s1541_s4, 128, %s69_s3, [#allocation10]  }
  0x38   :  { %1426 = dma.done.wait [#allocation4], 1024  }
  0x39   :  { %1427 = vsyncadd [#allocation4], 4294966272 }
  0x3a   :  { %1428 = dma.done.wait [#allocation7], 3072  }
  0x3b   :  { %1429 = vsyncadd [#allocation7], 4294964224 }
  0x3c   :  { %1430 = dma.done.wait [#allocation10], 2176  }
  0x3d   :  { %1431 = vsyncadd [#allocation10], 4294965120  ;;  %v1290_v0 = vld [vmem:[#allocation6 + $0x38] sm:$0xff]   ;;  %v1291_v1 = vld [vmem:[#allocation6 + $0x30] sm:$0xff]   ;;  %s1443_s2 = smov [#allocation12]  }
  0x3e   :  { %1104 = vmatprep.subr.bf16.mxu0 %v1290_v0  ;;  %v1292_v2 = vld [vmem:[#allocation6 + $0x28] sm:$0xff]   ;;  %v1293_v3 = vld [vmem:[#allocation6 + $0x20] sm:$0xff]   ;;  %v1294_v5 = vld [vmem:[#allocation6 + $0x18] sm:$0xff]   ;;  %s913_s4 = sshll.u32 %s1443_s2, 4  ;;  %s914_s4 = int_to_ptr.vmem [resolvable:$true] %s913_s4 }
  0x3f   :  { %1105 = vmatpush3.bf16.msra.mxu0 %v1290_v0  ;;  %v1298_v4 = vld [vmem:[#allocation3] sm:$0xff]   ;;  %v1295_v6 = vld [vmem:[#allocation6 + $0x10] sm:$0xff]   ;;  %v415_v7 = vld [vmem:[#allocation8 + $0x78] sm:$0xff]  ;;  %s1406_s19 = scalar_lea.vmem %s914_s4, 1024  ;;  %p1411_p12 = scmp.lt.s32.totalorder %s914_s4, %s914_s4 }
  0x40   :  { %1106 = vmatprep.subr.bf16.mxu0 %v1291_v1  ;;  %1120 = vmatprep.mubr.bf16.mxu0 %v1298_v4  ;;  %v414_v8 = vld [vmem:[#allocation8 + $0x70] sm:$0xff]  ;;  %v413_v9 = vld [vmem:[#allocation8 + $0x68] sm:$0xff]  ;;  %v412_v11 = vld [vmem:[#allocation8 + $0x60] sm:$0xff]  ;;  %p1407_p11 = scmp.ne.s32.totalorder %s914_s4, %s1406_s19  ;;  %p1412_p13 = scmp.lt.s32.totalorder %s1406_s19, %s1406_s19 }
  0x41   :  { %1136 = vmatprep.subr.mxu1 %v415_v7  ;;  %v1296_v10 = vld [vmem:[#allocation6 + $0x8] sm:$0xff]   ;;  %v411_v12 = vld [vmem:[#allocation8 + $0x58] sm:$0xff]  ;;  %v1297_v13 = vld [vmem:[#allocation6] sm:$0xff]  }
  0x42   :  { %1137 = vmatpush3.msra.mxu1 %v415_v7  ;;  %v410_v14 = vld [vmem:[#allocation8 + $0x50] sm:$0xff]  ;;  %v409_v15 = vld [vmem:[#allocation8 + $0x48] sm:$0xff]  ;;  %v408_v16 = vld [vmem:[#allocation8 + $0x40] sm:$0xff]  ;;  %p1413_p0 = por %p1412_p13, %p1411_p12 }
  0x43   :  { %1107 = vmatpush3.bf16.msra.mxu0 %v1291_v1  ;;  %1138 = vmatprep.subr.mxu1 %v414_v8  ;;  %v1299_v17 = vld [vmem:[#allocation3 + $0x8] sm:$0xff]   ;;  %v407_v18 = vld [vmem:[#allocation8 + $0x38] sm:$0xff]  ;;  %v1300_v19 = vld [vmem:[#allocation3 + $0x10] sm:$0xff]  }
  0x44   :  { %1108 = vmatprep.subr.bf16.mxu0 %v1292_v2  ;;  %1139 = vmatpush3.msra.mxu1 %v414_v8  ;;  %v406_v20 = vld [vmem:[#allocation8 + $0x30] sm:$0xff]  ;;  %v405_v21 = vld [vmem:[#allocation8 + $0x28] sm:$0xff]  ;;  %v404_v22 = vld [vmem:[#allocation8 + $0x20] sm:$0xff]  ;;  %p1414_p1 = pnand %p1413_p0, %p1407_p11 }
  0x45   :  { %1140 = vmatprep.subr.mxu1 %v413_v9  ;;  %v1301_v23 = vld [vmem:[#allocation3 + $0x18] sm:$0xff]   ;;  %v1302_v25 = vld [vmem:[#allocation3 + $0x20] sm:$0xff]   ;;  %v1303_v26 = vld [vmem:[#allocation3 + $0x28] sm:$0xff]  }
  0x46   :  { %1141 = vmatpush3.msra.mxu1 %v413_v9  ;;  %v403_v24 = vld [vmem:[#allocation8 + $0x18] sm:$0xff]  ;;  %v1304_v27 = vld [vmem:[#allocation3 + $0x30] sm:$0xff]   ;;  %v401_v30 = vld [vmem:[#allocation8 + $0x8] sm:$0xff] }
  0x47   :  { %1109 = vmatpush3.bf16.msra.mxu0 %v1292_v2  ;;  %1142 = vmatprep.subr.mxu1 %v412_v11  ;;  %v1305_v28 = vld [vmem:[#allocation3 + $0x38] sm:$0xff]   ;;  %v402_v29 = vld [vmem:[#allocation8 + $0x10] sm:$0xff]  ;;  %v400_v31 = vld [vmem:[#allocation8] sm:$0xff] }
  0x48   :  { %1110 = vmatprep.subr.bf16.mxu0 %v1293_v3  ;;  %1143 = vmatpush3.msra.mxu1 %v412_v11  ;;  %v629_v32 = vld [vmem:[#allocation9 + $0x78] sm:$0xff]  ;;  %v628_v33 = vld [vmem:[#allocation9 + $0x70] sm:$0xff]  ;;  %v627_v34 = vld [vmem:[#allocation9 + $0x68] sm:$0xff] }
  0x49   :  { %1144 = vmatprep.subr.mxu1 %v411_v12  ;;  %v626_v35 = vld [vmem:[#allocation9 + $0x60] sm:$0xff]  ;;  %v625_v36 = vld [vmem:[#allocation9 + $0x58] sm:$0xff]  ;;  %v624_v37 = vld [vmem:[#allocation9 + $0x50] sm:$0xff] }
  0x4a   :  { %1145 = vmatpush3.msra.mxu1 %v411_v12  ;;  %v623_v38 = vld [vmem:[#allocation9 + $0x48] sm:$0xff]  ;;  %v622_v39 = vld [vmem:[#allocation9 + $0x40] sm:$0xff]  ;;  %v621_v40 = vld [vmem:[#allocation9 + $0x38] sm:$0xff] }
  0x4b   :  { %1111 = vmatpush3.bf16.msra.mxu0 %v1293_v3  ;;  %1146 = vmatprep.subr.mxu1 %v410_v14  ;;  %v620_v41 = vld [vmem:[#allocation9 + $0x30] sm:$0xff]  ;;  %v619_v42 = vld [vmem:[#allocation9 + $0x28] sm:$0xff]  ;;  %v618_v43 = vld [vmem:[#allocation9 + $0x20] sm:$0xff] }
  0x4c   :  { %1112 = vmatprep.subr.bf16.mxu0 %v1294_v5  ;;  %1147 = vmatpush3.msra.mxu1 %v410_v14  ;;  %v617_v60 = vld [vmem:[#allocation9 + $0x18] sm:$0xff]  ;;  %v616_v61 = vld [vmem:[#allocation9 + $0x10] sm:$0xff]  ;;  %v615_v62 = vld [vmem:[#allocation9 + $0x8] sm:$0xff] }
  0x4d   :  { %1148 = vmatprep.subr.mxu1 %v409_v15  ;;  %v614_v63 = vld [vmem:[#allocation9] sm:$0xff] }
  0x4e   :  { %1149 = vmatpush3.msra.mxu1 %v409_v15  ;;  %v1495_v0 = vld [vmem:[#allocation11] ss:$0 sm:$0xff] }
  0x4f   :  { %1113 = vmatpush3.bf16.msra.mxu0 %v1294_v5  ;;  %1150 = vmatprep.subr.mxu1 %v408_v16 }
  0x50   :  { %1114 = vmatprep.subr.bf16.mxu0 %v1295_v6  ;;  %1151 = vmatpush3.msra.mxu1 %v408_v16 }
  0x51   :  { %1152 = vmatprep.subr.mxu1 %v407_v18 }
  0x52   :  { %1153 = vmatpush3.msra.mxu1 %v407_v18 }
  0x53   :  { %1115 = vmatpush3.bf16.msra.mxu0 %v1295_v6  ;;  %1154 = vmatprep.subr.mxu1 %v406_v20 }
  0x54   :  { %1116 = vmatprep.subr.bf16.mxu0 %v1296_v10  ;;  %1155 = vmatpush3.msra.mxu1 %v406_v20 }
  0x55   :  { %1156 = vmatprep.subr.mxu1 %v405_v21 }
  0x56   :  { %1157 = vmatpush3.msra.mxu1 %v405_v21 }
  0x57   :  { %1117 = vmatpush3.bf16.msra.mxu0 %v1296_v10  ;;  %1158 = vmatprep.subr.mxu1 %v404_v22 }
  0x58   :  { %1118 = vmatprep.subr.bf16.mxu0 %v1297_v13  ;;  %1159 = vmatpush3.msra.mxu1 %v404_v22 }
  0x59   :  { %1160 = vmatprep.subr.mxu1 %v403_v24 }
  0x5a   :  { %1161 = vmatpush3.msra.mxu1 %v403_v24 }
  0x5b   :  { %1119 = vmatpush3.bf16.msra.mxu0 %v1297_v13  ;;  %1162 = vmatprep.subr.mxu1 %v402_v29 }
  0x5c   :  { %1163 = vmatpush3.msra.mxu1 %v402_v29  ;;  %1192 = vmatprep.subr.mxu0 %v629_v32 }
  0x5d   :  { %1164 = vmatprep.subr.mxu1 %v401_v30 }
  0x5e   :  { %1121 = vmatmul.mubr.bf16.vlgmr.msra.gmra.mxu0 %v1299_v17  ;;  %1165 = vmatpush3.msra.mxu1 %v401_v30 }
  0x5f   :  { %1124 = vmatprep.mubr.bf16.mxu0 %v1300_v19  ;;  %1166 = vmatprep.subr.mxu1 %v400_v31 }
  0x60   :  { %1167 = vmatpush3.msra.mxu1 %v400_v31  ;;  %1193 = vmatpush3.msra.mxu0 %v629_v32 }
  0x61   :  { %1248 = vmatprep.subr.mxu1 %v629_v32  ;;  %1194 = vmatprep.subr.mxu0 %v628_v33 }
  0x62   :  { %1195 = vmatpush3.msra.mxu0 %v628_v33 }
  0x63   :  { %1196 = vmatprep.subr.mxu0 %v627_v34 }
  0x64   :  { %1197 = vmatpush3.msra.mxu0 %v627_v34 }
  0x65   :  { %1198 = vmatprep.subr.mxu0 %v626_v35 }
  0x66   :  { %1125 = vmatmul.mubr.bf16.gmra.mxu0 %v1301_v23 }
  0x67   :  { %1128 = vmatprep.mubr.bf16.mxu0 %v1302_v25  ;;  %1199 = vmatpush3.msra.mxu0 %v626_v35 }
  0x68   :  { %1200 = vmatprep.subr.mxu0 %v625_v36 }
  0x69   :  { %1201 = vmatpush3.msra.mxu0 %v625_v36 }
  0x6a   :  { %1202 = vmatprep.subr.mxu0 %v624_v37 }
  0x6b   :  { %1203 = vmatpush3.msra.mxu0 %v624_v37 }
  0x6c   :  { %1204 = vmatprep.subr.mxu0 %v623_v38 }
  0x6d   :  { %1205 = vmatpush3.msra.mxu0 %v623_v38 }
  0x6e   :  { %1129 = vmatmul.mubr.bf16.gmra.mxu0 %v1303_v26  ;;  %1206 = vmatprep.subr.mxu0 %v622_v39 }
  0x6f   :  { %1132 = vmatprep.mubr.bf16.mxu0 %v1304_v27  ;;  %1207 = vmatpush3.msra.mxu0 %v622_v39 }
  0x70   :  { %1208 = vmatprep.subr.mxu0 %v621_v40 }
  0x71   :  { %1209 = vmatpush3.msra.mxu0 %v621_v40 }
  0x72   :  { %1210 = vmatprep.subr.mxu0 %v620_v41 }
  0x73   :  { %1211 = vmatpush3.msra.mxu0 %v620_v41 }
  0x74   :  { %1212 = vmatprep.subr.mxu0 %v619_v42 }
  0x75   :  { %1213 = vmatpush3.msra.mxu0 %v619_v42 }
  0x76   :  { %1133 = vmatmul.mubr.bf16.gmra.mxu0 %v1305_v28  ;;  %1214 = vmatprep.subr.mxu0 %v618_v43 }
  0x77   :  { %1215 = vmatpush3.msra.mxu0 %v618_v43 }
  0x78   :  { %1216 = vmatprep.subr.mxu0 %v617_v60 }
  0x79   :  { %1217 = vmatpush3.msra.mxu0 %v617_v60 }
  0x7a   :  { %1218 = vmatprep.subr.mxu0 %v616_v61 }
  0x7b   :  { %1219 = vmatpush3.msra.mxu0 %v616_v61 }
  0x7c   :  { %1220 = vmatprep.subr.mxu0 %v615_v62 }
  0x7d   :  { %1221 = vmatpush3.msra.mxu0 %v615_v62 }
  0x7e   :  { %1222 = vmatprep.subr.mxu0 %v614_v63 }
  0x7f   :  { %1223 = vmatpush3.msra.mxu0 %v614_v63 }
 0x11e   :  { %v1122_v44 = vpop.f32.mrf.mxu0 }
 0x120   :  { %v286_v45 = vpop.f32.mrf.mxu0 }
 0x121   :  { %1168 = vmatprep.mubr.f32.mxu1 %v286_v45 }
 0x122   :  { %v1123_v46 = vpop.f32.mrf.mxu0 }
 0x124   :  { %v289_v47 = vpop.f32.mrf.mxu0 }
 0x125   :  { %1169 = vmatmul.mubr.f32.vlgmr.msra.gmra.mxu1 %v289_v47 }
 0x126   :  { %v1126_v48 = vpop.f32.mrf.mxu0  ;;  %1171 = vmatprep.mubr.f32.mxu1 %v1122_v44  ;;  %1264 = vmatpush3.msra.mxu1 %v629_v32 }
 0x127   :  { %1249 = vmatprep.subr.mxu1 %v628_v33 }
 0x128   :  { %v302_v49 = vpop.f32.mrf.mxu0  ;;  %1265 = vmatpush3.msra.mxu1 %v628_v33 }
 0x129   :  { %1172 = vmatmul.mubr.f32.gmra.mxu1 %v1123_v46  ;;  %1250 = vmatprep.subr.mxu1 %v627_v34 }
 0x12a   :  { %v1127_v50 = vpop.f32.mrf.mxu0  ;;  %1174 = vmatprep.mubr.f32.mxu1 %v302_v49  ;;  %1266 = vmatpush3.msra.mxu1 %v627_v34 }
 0x12b   :  { %1251 = vmatprep.subr.mxu1 %v626_v35 }
 0x12c   :  { %v305_v51 = vpop.f32.mrf.mxu0  ;;  %1267 = vmatpush3.msra.mxu1 %v626_v35 }
 0x12d   :  { %1175 = vmatmul.mubr.f32.gmra.mxu1 %v305_v51  ;;  %1252 = vmatprep.subr.mxu1 %v625_v36 }
 0x12e   :  { %v1130_v52 = vpop.f32.mrf.mxu0  ;;  %1177 = vmatprep.mubr.f32.mxu1 %v1126_v48  ;;  %1268 = vmatpush3.msra.mxu1 %v625_v36 }
 0x12f   :  { %1253 = vmatprep.subr.mxu1 %v624_v37 }
 0x130   :  { %v318_v53 = vpop.f32.mrf.mxu0  ;;  %1269 = vmatpush3.msra.mxu1 %v624_v37 }
 0x131   :  { %1178 = vmatmul.mubr.f32.gmra.mxu1 %v1127_v50  ;;  %1254 = vmatprep.subr.mxu1 %v623_v38 }
 0x132   :  { %v1131_v54 = vpop.f32.mrf.mxu0  ;;  %1180 = vmatprep.mubr.f32.mxu1 %v318_v53  ;;  %1270 = vmatpush3.msra.mxu1 %v623_v38 }
 0x133   :  { %1255 = vmatprep.subr.mxu1 %v622_v39 }
 0x134   :  { %v321_v55 = vpop.f32.mrf.mxu0  ;;  %1271 = vmatpush3.msra.mxu1 %v622_v39 }
 0x135   :  { %1181 = vmatmul.mubr.f32.gmra.mxu1 %v321_v55  ;;  %1256 = vmatprep.subr.mxu1 %v621_v40 }
 0x136   :  { %v1134_v56 = vpop.f32.mrf.mxu0  ;;  %1183 = vmatprep.mubr.f32.mxu1 %v1130_v52  ;;  %1272 = vmatpush3.msra.mxu1 %v621_v40 }
 0x137   :  { %1257 = vmatprep.subr.mxu1 %v620_v41 }
 0x138   :  { %v334_v57 = vpop.f32.mrf.mxu0  ;;  %1273 = vmatpush3.msra.mxu1 %v620_v41 }
 0x139   :  { %1184 = vmatmul.mubr.f32.gmra.mxu1 %v1131_v54  ;;  %1258 = vmatprep.subr.mxu1 %v619_v42 }
 0x13a   :  { %v1135_v58 = vpop.f32.mrf.mxu0  ;;  %1186 = vmatprep.mubr.f32.mxu1 %v334_v57  ;;  %1274 = vmatpush3.msra.mxu1 %v619_v42 }
 0x13b   :  { %1259 = vmatprep.subr.mxu1 %v618_v43 }
 0x13c   :  { %v337_v59 = vpop.f32.mrf.mxu0  ;;  %1275 = vmatpush3.msra.mxu1 %v618_v43 }
 0x13d   :  { %1187 = vmatmul.mubr.f32.gmra.mxu1 %v337_v59  ;;  %1260 = vmatprep.subr.mxu1 %v617_v60 }
 0x13e   :  { %1189 = vmatprep.mubr.f32.mxu1 %v1134_v56  ;;  %1276 = vmatpush3.msra.mxu1 %v617_v60 }
 0x13f   :  { %1261 = vmatprep.subr.mxu1 %v616_v61 }
 0x140   :  { %1277 = vmatpush3.msra.mxu1 %v616_v61 }
 0x141   :  { %1190 = vmatmul.mubr.f32.gmra.mxu1 %v1135_v58  ;;  %1262 = vmatprep.subr.mxu1 %v615_v62 }
 0x142   :  { %1278 = vmatpush3.msra.mxu1 %v615_v62 }
 0x143   :  { %1263 = vmatprep.subr.mxu1 %v614_v63 }
 0x144   :  { %1279 = vmatpush3.msra.mxu1 %v614_v63 }
 0x1e5   :  { %v1170_v1 = vpop.f32.mrf.mxu1 }
 0x1e6   :  { %v493_v2 = vadd.f32 %v1170_v1, %v1495_v0 }
 0x1e7   :  { %v487_v3 = vpop.f32.mrf.mxu1 }
 0x1e8   :  { %v488_v4 = vadd.f32 %v1495_v0, %v487_v3  ;;  %v583_v5 = vmul.f32 0.2, %v493_v2  ;;  %vm567_vm0 = vcmp.ge.f32.partialorder %v493_v2, 0.0 }
 0x1e9   :  { %v1173_v6 = vpop.f32.mrf.mxu1 }
 0x1ea   :  { %v582_v7 = vmul.f32 0.2, %v488_v4  ;;  %v503_v8 = vadd.f32 %v1173_v6, %v1495_v0  ;;  %vm566_vm1 = vcmp.ge.f32.partialorder %v488_v4, 0.0  ;;  %v599_v12 = vsel %vm567_vm0, %v493_v2, %v583_v5  ;;  %v1513_v2 = vld [vmem:[#allocation11 + $0x1] ss:$0 sm:$0xff] }
 0x1eb   :  { %v497_v9 = vpop.f32.mrf.mxu1 }
 0x1ec   :  { %v498_v10 = vadd.f32 %v1495_v0, %v497_v9  ;;  %v598_v11 = vsel %vm566_vm1, %v488_v4, %v582_v7  ;;  %v585_v13 = vmul.f32 0.2, %v503_v8  ;;  %vm569_vm3 = vcmp.ge.f32.partialorder %v503_v8, 0.0 }
 0x1ed   :  { %v1176_v14 = vpop.f32.mrf.mxu1  ;;  %1224 = vmatprep.mubr.f32.mxu0 %v598_v11 }
 0x1ee   :  { %v584_v15 = vmul.f32 0.2, %v498_v10  ;;  %v513_v16 = vadd.f32 %v1176_v14, %v1495_v0  ;;  %1225 = vmatmul.mubr.f32.vlgmr.msra.gmra.mxu0 %v599_v12  ;;  %vm568_vm2 = vcmp.ge.f32.partialorder %v498_v10, 0.0  ;;  %v601_v22 = vsel %vm569_vm3, %v503_v8, %v585_v13 }
 0x1ef   :  { %v507_v17 = vpop.f32.mrf.mxu1 }
 0x1f0   :  { %v508_v18 = vadd.f32 %v1495_v0, %v507_v17  ;;  %v600_v19 = vsel %vm568_vm2, %v498_v10, %v584_v15  ;;  %v587_v20 = vmul.f32 0.2, %v513_v16  ;;  %vm571_vm5 = vcmp.ge.f32.partialorder %v513_v16, 0.0 }
 0x1f1   :  { %v1179_v21 = vpop.f32.mrf.mxu1  ;;  %1227 = vmatprep.mubr.f32.mxu0 %v600_v19 }
 0x1f2   :  { %v586_v23 = vmul.f32 0.2, %v508_v18  ;;  %v523_v24 = vadd.f32 %v1179_v21, %v1495_v0  ;;  %1228 = vmatmul.mubr.f32.gmra.mxu0 %v601_v22  ;;  %vm570_vm4 = vcmp.ge.f32.partialorder %v508_v18, 0.0  ;;  %v603_v30 = vsel %vm571_vm5, %v513_v16, %v587_v20 }
 0x1f3   :  { %v517_v25 = vpop.f32.mrf.mxu1 }
 0x1f4   :  { %v518_v26 = vadd.f32 %v1495_v0, %v517_v25  ;;  %v602_v27 = vsel %vm570_vm4, %v508_v18, %v586_v23  ;;  %v589_v28 = vmul.f32 0.2, %v523_v24  ;;  %vm573_vm7 = vcmp.ge.f32.partialorder %v523_v24, 0.0 }
 0x1f5   :  { %v1182_v29 = vpop.f32.mrf.mxu1  ;;  %1230 = vmatprep.mubr.f32.mxu0 %v602_v27 }
 0x1f6   :  { %v588_v31 = vmul.f32 0.2, %v518_v26  ;;  %v533_v32 = vadd.f32 %v1182_v29, %v1495_v0  ;;  %1231 = vmatmul.mubr.f32.gmra.mxu0 %v603_v30  ;;  %vm572_vm6 = vcmp.ge.f32.partialorder %v518_v26, 0.0  ;;  %v605_v38 = vsel %vm573_vm7, %v523_v24, %v589_v28 }
 0x1f7   :  { %v527_v33 = vpop.f32.mrf.mxu1 }
 0x1f8   :  { %v528_v34 = vadd.f32 %v1495_v0, %v527_v33  ;;  %v604_v35 = vsel %vm572_vm6, %v518_v26, %v588_v31  ;;  %v591_v36 = vmul.f32 0.2, %v533_v32  ;;  %vm575_vm8 = vcmp.ge.f32.partialorder %v533_v32, 0.0 }
 0x1f9   :  { %v1185_v37 = vpop.f32.mrf.mxu1  ;;  %1233 = vmatprep.mubr.f32.mxu0 %v604_v35 }
 0x1fa   :  { %v590_v39 = vmul.f32 0.2, %v528_v34  ;;  %v543_v40 = vadd.f32 %v1185_v37, %v1495_v0  ;;  %1234 = vmatmul.mubr.f32.gmra.mxu0 %v605_v38  ;;  %vm574_vm9 = vcmp.ge.f32.partialorder %v528_v34, 0.0  ;;  %v607_v44 = vsel %vm575_vm8, %v533_v32, %v591_v36 }
 0x1fb   :  { %v537_v41 = vpop.f32.mrf.mxu1 }
 0x1fc   :  { %v538_v42 = vadd.f32 %v1495_v0, %v537_v41  ;;  %v606_v43 = vsel %vm574_vm9, %v528_v34, %v590_v39  ;;  %v593_v45 = vmul.f32 0.2, %v543_v40  ;;  %vm577_vm11 = vcmp.ge.f32.partialorder %v543_v40, 0.0 }
 0x1fd   :  { %v1188_v46 = vpop.f32.mrf.mxu1  ;;  %1236 = vmatprep.mubr.f32.mxu1 %v606_v43 }
 0x1fe   :  { %v592_v47 = vmul.f32 0.2, %v538_v42  ;;  %v553_v48 = vadd.f32 %v1188_v46, %v1495_v0  ;;  %1237 = vmatmul.mubr.f32.vlgmr.msra.gmra.mxu1 %v607_v44  ;;  %vm576_vm10 = vcmp.ge.f32.partialorder %v538_v42, 0.0  ;;  %v609_v54 = vsel %vm577_vm11, %v543_v40, %v593_v45 }
 0x1ff   :  { %v547_v49 = vpop.f32.mrf.mxu1 }
 0x200   :  { %v548_v50 = vadd.f32 %v1495_v0, %v547_v49  ;;  %v608_v51 = vsel %vm576_vm10, %v538_v42, %v592_v47  ;;  %v595_v52 = vmul.f32 0.2, %v553_v48  ;;  %vm579_vm13 = vcmp.ge.f32.partialorder %v553_v48, 0.0 }
 0x201   :  { %v1191_v53 = vpop.f32.mrf.mxu1  ;;  %1239 = vmatprep.mubr.f32.mxu1 %v608_v51 }
 0x202   :  { %v594_v55 = vmul.f32 0.2, %v548_v50  ;;  %v563_v56 = vadd.f32 %v1191_v53, %v1495_v0  ;;  %1240 = vmatmul.mubr.f32.gmra.mxu1 %v609_v54  ;;  %vm578_vm12 = vcmp.ge.f32.partialorder %v548_v50, 0.0  ;;  %v611_v61 = vsel %vm579_vm13, %v553_v48, %v595_v52 }
 0x203   :  { %v557_v57 = vpop.f32.mrf.mxu1 }
 0x204   :  { %v558_v58 = vadd.f32 %v1495_v0, %v557_v57  ;;  %v610_v59 = vsel %vm578_vm12, %v548_v50, %v594_v55  ;;  %v597_v60 = vmul.f32 0.2, %v563_v56  ;;  %vm581_vm15 = vcmp.ge.f32.partialorder %v563_v56, 0.0 }
 0x205   :  { %1242 = vmatprep.mubr.f32.mxu1 %v610_v59 }
 0x206   :  { %v596_v62 = vmul.f32 0.2, %v558_v58  ;;  %1243 = vmatmul.mubr.f32.gmra.mxu1 %v611_v61  ;;  %vm580_vm14 = vcmp.ge.f32.partialorder %v558_v58, 0.0  ;;  %v613_v1 = vsel %vm581_vm15, %v563_v56, %v597_v60 }
 0x208   :  { %v612_v63 = vsel %vm580_vm14, %v558_v58, %v596_v62 }
 0x209   :  { %1245 = vmatprep.mubr.f32.mxu1 %v612_v63 }
 0x20a   :  { %1246 = vmatmul.mubr.f32.gmra.mxu1 %v613_v1 }
 0x2ae   :  { %v1226_v3 = vpop.f32.mrf.mxu0 }
 0x2af   :  { %v707_v4 = vadd.f32 %v1226_v3, %v1513_v2 }
 0x2b0   :  { %v701_v5 = vpop.f32.mrf.mxu0 }
 0x2b1   :  { %v797_v6 = vmul.f32 0.2, %v707_v4  ;;  %v702_v0 = vadd.f32 %v1513_v2, %v701_v5  ;;  %vm781_vm0 = vcmp.ge.f32.partialorder %v707_v4, 0.0 }
 0x2b2   :  { %v1229_v7 = vpop.f32.mrf.mxu0 }
 0x2b3   :  { %vm780_vm1 = vcmp.ge.f32.partialorder %v702_v0, 0.0  ;;  %v796_v8 = vmul.f32 0.2, %v702_v0  ;;  %v717_v9 = vadd.f32 %v1229_v7, %v1513_v2  ;;  %v813_v11 = vsel %vm781_vm0, %v707_v4, %v797_v6 }
 0x2b4   :  { %v711_v10 = vpop.f32.mrf.mxu0 }
 0x2b5   :  { %v812_v12 = vsel %vm780_vm1, %v702_v0, %v796_v8  ;;  %v799_v13 = vmul.f32 0.2, %v717_v9  ;;  %v712_v14 = vadd.f32 %v1513_v2, %v711_v10  ;;  %vm783_vm2 = vcmp.ge.f32.partialorder %v717_v9, 0.0 }
 0x2b6   :  { %v980_v15 = vpack.c.bf16 %v813_v11, %v812_v12  ;;  %v1232_v16 = vpop.f32.mrf.mxu0 }
 0x2b7   :  { %vm782_vm3 = vcmp.ge.f32.partialorder %v712_v14, 0.0  ;;  %v798_v17 = vmul.f32 0.2, %v712_v14  ;;  %v727_v18 = vadd.f32 %v1232_v16, %v1513_v2  ;;  %v815_v20 = vsel %vm783_vm2, %v717_v9, %v799_v13 }
 0x2b8   :  { %981 = vst [vmem:[#allocation12] sm:$0xff] %v980_v15   ;;  %v721_v19 = vpop.f32.mrf.mxu0 }
 0x2b9   :  { %v814_v21 = vsel %vm782_vm3, %v712_v14, %v798_v17  ;;  %v801_v22 = vmul.f32 0.2, %v727_v18  ;;  %v722_v23 = vadd.f32 %v1513_v2, %v721_v19  ;;  %vm785_vm4 = vcmp.ge.f32.partialorder %v727_v18, 0.0 }
 0x2ba   :  { %v985_v24 = vpack.c.bf16 %v815_v20, %v814_v21  ;;  %v1235_v25 = vpop.f32.mrf.mxu0 }
 0x2bb   :  { %vm784_vm5 = vcmp.ge.f32.partialorder %v722_v23, 0.0  ;;  %v800_v26 = vmul.f32 0.2, %v722_v23  ;;  %v737_v27 = vadd.f32 %v1235_v25, %v1513_v2  ;;  %v817_v29 = vsel %vm785_vm4, %v727_v18, %v801_v22 }
 0x2bc   :  { %1017 = vst [vmem:[#allocation12 + $0x8] sm:$0xff] %v985_v24   ;;  %v731_v28 = vpop.f32.mrf.mxu0 }
 0x2bd   :  { %v816_v30 = vsel %vm784_vm5, %v722_v23, %v800_v26  ;;  %v803_v31 = vmul.f32 0.2, %v737_v27  ;;  %v732_v32 = vadd.f32 %v1513_v2, %v731_v28  ;;  %vm787_vm6 = vcmp.ge.f32.partialorder %v737_v27, 0.0 }
 0x2be   :  { %v990_v33 = vpack.c.bf16 %v817_v29, %v816_v30  ;;  %v1238_v34 = vpop.f32.mrf.mxu1 }
 0x2bf   :  { %vm786_vm7 = vcmp.ge.f32.partialorder %v732_v32, 0.0  ;;  %v802_v35 = vmul.f32 0.2, %v732_v32  ;;  %v747_v36 = vadd.f32 %v1238_v34, %v1513_v2  ;;  %v819_v38 = vsel %vm787_vm6, %v737_v27, %v803_v31 }
 0x2c0   :  { %1018 = vst [vmem:[#allocation12 + $0x10] sm:$0xff] %v990_v33   ;;  %v741_v37 = vpop.f32.mrf.mxu1 }
 0x2c1   :  { %v818_v39 = vsel %vm786_vm7, %v732_v32, %v802_v35  ;;  %v805_v40 = vmul.f32 0.2, %v747_v36  ;;  %v742_v41 = vadd.f32 %v1513_v2, %v741_v37  ;;  %vm789_vm8 = vcmp.ge.f32.partialorder %v747_v36, 0.0 }
 0x2c2   :  { %v995_v42 = vpack.c.bf16 %v819_v38, %v818_v39  ;;  %v1241_v43 = vpop.f32.mrf.mxu1 }
 0x2c3   :  { %vm788_vm9 = vcmp.ge.f32.partialorder %v742_v41, 0.0  ;;  %v804_v44 = vmul.f32 0.2, %v742_v41  ;;  %v757_v45 = vadd.f32 %v1241_v43, %v1513_v2  ;;  %v821_v47 = vsel %vm789_vm8, %v747_v36, %v805_v40 }
 0x2c4   :  { %1019 = vst [vmem:[#allocation12 + $0x18] sm:$0xff] %v995_v42   ;;  %v751_v46 = vpop.f32.mrf.mxu1 }
 0x2c5   :  { %v820_v48 = vsel %vm788_vm9, %v742_v41, %v804_v44  ;;  %v807_v49 = vmul.f32 0.2, %v757_v45  ;;  %v752_v50 = vadd.f32 %v1513_v2, %v751_v46  ;;  %vm791_vm10 = vcmp.ge.f32.partialorder %v757_v45, 0.0 }
 0x2c6   :  { %v1000_v51 = vpack.c.bf16 %v821_v47, %v820_v48  ;;  %v1244_v52 = vpop.f32.mrf.mxu1 }
 0x2c7   :  { %vm790_vm11 = vcmp.ge.f32.partialorder %v752_v50, 0.0  ;;  %v806_v53 = vmul.f32 0.2, %v752_v50  ;;  %v767_v54 = vadd.f32 %v1244_v52, %v1513_v2  ;;  %v823_v56 = vsel %vm791_vm10, %v757_v45, %v807_v49 }
 0x2c8   :  { %1020 = vst [vmem:[#allocation12 + $0x20] sm:$0xff] %v1000_v51   ;;  %v761_v55 = vpop.f32.mrf.mxu1 }
 0x2c9   :  { %v822_v57 = vsel %vm790_vm11, %v752_v50, %v806_v53  ;;  %v809_v58 = vmul.f32 0.2, %v767_v54  ;;  %v762_v59 = vadd.f32 %v1513_v2, %v761_v55  ;;  %vm793_vm12 = vcmp.ge.f32.partialorder %v767_v54, 0.0 }
 0x2ca   :  { %v1005_v60 = vpack.c.bf16 %v823_v56, %v822_v57  ;;  %v1247_v61 = vpop.f32.mrf.mxu1 }
 0x2cb   :  { %vm792_vm13 = vcmp.ge.f32.partialorder %v762_v59, 0.0  ;;  %v808_v62 = vmul.f32 0.2, %v762_v59  ;;  %v777_v63 = vadd.f32 %v1247_v61, %v1513_v2  ;;  %v825_v3 = vsel %vm793_vm12, %v767_v54, %v809_v58 }
 0x2cc   :  { %1021 = vst [vmem:[#allocation12 + $0x28] sm:$0xff] %v1005_v60   ;;  %v771_v1 = vpop.f32.mrf.mxu1 }
 0x2cd   :  { %v824_v4 = vsel %vm792_vm13, %v762_v59, %v808_v62  ;;  %v811_v5 = vmul.f32 0.2, %v777_v63  ;;  %v772_v6 = vadd.f32 %v1513_v2, %v771_v1  ;;  %vm795_vm14 = vcmp.ge.f32.partialorder %v777_v63, 0.0 }
 0x2ce   :  { %v1010_v0 = vpack.c.bf16 %v825_v3, %v824_v4 }
 0x2cf   :  { %vm794_vm15 = vcmp.ge.f32.partialorder %v772_v6, 0.0  ;;  %v810_v7 = vmul.f32 0.2, %v772_v6  ;;  %v827_v8 = vsel %vm795_vm14, %v777_v63, %v811_v5 }
 0x2d0   :  { %1022 = vst [vmem:[#allocation12 + $0x30] sm:$0xff] %v1010_v0  }
 0x2d1   :  { %v826_v9 = vsel %vm794_vm15, %v772_v6, %v810_v7 }
 0x2d2   :  { %v1015_v10 = vpack.c.bf16 %v827_v8, %v826_v9 }
 0x2d4   :  { %1023 = vst [vmem:[#allocation12 + $0x38] sm:$0xff] %v1015_v10  }
 0x2d5   :  { %1417 = shalt.err (!%p1414_p1)
}
 0x2d6   :  { %919 = dma.vmem_to_hbm [thread:$0]  %s914_s4, 1024, %s1542_s5, [#allocation5], %s1435_s21, %s1435_s21, %s1436_s22  }
 0x2d7   :  { %1432 = dma.done.wait [#allocation5], 1024  }
 0x2d8   :  { %1433 = vsyncadd [#allocation5], 4294966272 }
 0x2d9   :  { %923 = vsyncpa [#allocation4], 1 }
 0x2da   :  { %924 = vsyncpa [#allocation7], 1 }
 0x2db   :  { %925 = vsyncpa [#allocation10], 1 }
 0x2dc   :  { %926 = vsyncpa [#allocation5], 1 }

</bundles_post_ra>
